<compile_context>
chip_gen: v5e
topology: v5e:2x2
jax: 0.10.0
libtpu: 0.0.40
codegen_flags: <defaults>
</compile_context>

<pallas_src>
import functools

import jax
import jax.numpy as jnp
import numpy as np
from jax.experimental import pallas as pl
from jax.experimental.pallas import tpu as pltpu

_LANE = 128
_SUBLANE = 8


def _vmem_capacity_bytes():
    try:
        return int(pltpu.get_tpu_info().vmem_capacity_bytes)
    except Exception:
        return 64 * 1024 * 1024  # conservative default (v7x per-TensorCore VMEM)


def _scale(term, tap):
    """Multiply by a static Python tap value, strength-reduced for 1.0 / 2.0."""
    if tap == 1.0:
        return term
    if tap == 2.0:
        return term + term          # cheaper than a mul, identical result
    return term * tap


def _shift(a, off, axis):
    """out[..., i, ...] = a[..., i + off, ...] along `axis`, zero outside bounds."""
    if off == 0:
        return a
    n = a.shape[axis]
    zshape = list(a.shape)
    zshape[axis] = abs(off)
    zeros = jnp.zeros(zshape, a.dtype)
    idx = [slice(None)] * a.ndim
    if off > 0:
        idx[axis] = slice(off, n)
        return jnp.concatenate([a[tuple(idx)], zeros], axis=axis)
    idx[axis] = slice(0, n + off)
    return jnp.concatenate([zeros, a[tuple(idx)]], axis=axis)


def _subsample(a, stride, n_keep, axis):
    """Keep indices 0, stride, 2*stride, ... along `axis`."""
    if stride == 1:
        return a
    n = a.shape[axis]
    if axis < a.ndim - 2:
        # Leading (vreg-batch) axis: free leading-dim reshape + plain slice.
        pad_amt = n_keep * stride - n
        if pad_amt > 0:
            zshape = list(a.shape)
            zshape[axis] = pad_amt
            a = jnp.concatenate([a, jnp.zeros(zshape, a.dtype)], axis=axis)
        new_shape = a.shape[:axis] + (n_keep, stride) + a.shape[axis + 1:]
        a = a.reshape(new_shape)
        idx = [slice(None)] * a.ndim
        idx[axis + 1] = 0
        return a[tuple(idx)]
    # Sublane / lane axis: gather kept positions with static slices (relayout
    # work on the otherwise-idle XLU; only runs when stride > 1).
    idx = [slice(None)] * a.ndim
    parts = []
    for k in range(n_keep):
        idx[axis] = slice(k * stride, k * stride + 1)
        parts.append(a[tuple(idx)])
    return jnp.concatenate(parts, axis=axis)


def _separable_pass(a, taps, pad, axis):
    out = None
    for i, tap in enumerate(taps):
        term = _scale(_shift(a, i - pad, axis), tap)
        out = term if out is None else out + term
    return out


def _blur_kernel(x_ref, o_ref, *, taps, pad, norm, stride, h_axis, w_axis):
    """Scratch-free separable blur over one block; planes are independent lanes."""
    # TODO(synk): bf16-throughout compute path for bf16 inputs on v6e/v7x (keep
    # f32 on v5e); f32 accumulation keeps parity with the f32 reference here.
    x = x_ref[...].astype(jnp.float32)

    v = _separable_pass(x, taps, pad, h_axis)                    # vertical [f]
    v = _subsample(v, stride, o_ref.shape[h_axis], h_axis)
    out = _separable_pass(v, taps, pad, w_axis)                  # horizontal [f]
    out = _subsample(out, stride, o_ref.shape[w_axis], w_axis)

    if norm != 1.0:
        out = out * norm                                         # single normalization
    o_ref[...] = out.astype(o_ref.dtype)


@functools.partial(
    jax.jit,
    static_argnames=("f", "normalize", "flip", "stride", "max_block_elems"))
def blur2d(x, f=(1.0, 2.0, 1.0), normalize=True, flip=False, stride=1,
           max_block_elems=None):
    """Depthwise separable blur matching Blur2d.forward (NCHW input)."""
    if f is None:                       # PyTorch module: identity when f is None
        return x

    fa = np.asarray(f, dtype=np.float64)
    if fa.ndim != 1:
        raise ValueError(
            "Blur2d expects a 1-D separable filter `f` (the PyTorch module "
            f"builds outer(f, f)); got shape {fa.shape}")
    taps = tuple(float(t) for t in fa)
    if flip:
        taps = taps[::-1]
    K = len(taps)
    if K % 2 != 1:
        raise ValueError("blur filter length must be odd (padding=(K-1)//2)")
    pad = (K - 1) // 2
    norm = 1.0 / (sum(taps) ** 2) if normalize else 1.0
    s = int(stride)

    N, C, H, W = x.shape
    NC = N * C
    H_out = (H + 2 * pad - K) // s + 1
    W_out = (W + 2 * pad - K) // s + 1

    itemsize = jnp.dtype(x.dtype).itemsize
    cap = _vmem_capacity_bytes()
    # Per block element: 2x double-buffered input + 2x output + ~3 live f32 temps.
    per_elem = 4 * itemsize + 12
    if max_block_elems is None:
        max_block_elems = max(1, min(int(0.45 * cap), 56 * 1024 * 1024) // per_elem)

    fits = H * W * min(NC, _LANE) <= max_block_elems
    use_lane_dense = fits and (W < _LANE or NC >= W)

    if use_lane_dense:
        # ---- lane-dense path: (H, W, N*C) with planes on the lane axis -------
        if NC <= _LANE:
            L = NC
        else:
            l_cap = max(1, max_block_elems // (H * W))
            l_cap = max(_LANE, (l_cap // _LANE) * _LANE)
            # Prefer >= 4 grid steps (2 per TensorCore on dual-core parts) as
            # long as the blocks stay >= ~512K elements.
            l_4 = max(_LANE, (pl.cdiv(NC, 4) // _LANE) * _LANE)
            if l_4 * H * W >= 512 * 1024:
                l_cap = min(l_cap, l_4)
            L = min(l_cap, NC)
        grid = (pl.cdiv(NC, L),)
        block_elems = H * W * L

        x_in = jnp.transpose(x, (2, 3, 0, 1)).reshape(H, W, NC)
        kern = functools.partial(_blur_kernel, taps=taps, pad=pad, norm=norm,
                                 stride=s, h_axis=0, w_axis=1)
        in_specs = [pl.BlockSpec((H, W, L), lambda i: (0, 0, i))]
        out_specs = pl.BlockSpec((H_out, W_out, L), lambda i: (0, 0, i))
        out_shape = jax.ShapeDtypeStruct((H_out, W_out, NC), x.dtype)
    else:
        # ---- fallback for very large spatial extents: (N*C, H, W) ------------
        # Here W >= 128 so lanes are dense with W on the lane axis; planes are
        # tiled across the grid and stride is applied in the wrapper.
        # TODO(synk): spatial halo tiling + in-kernel stride for this path.
        P = max(1, min(NC, max_block_elems // max(1, H * W)))
        grid = (pl.cdiv(NC, P),)
        block_elems = P * H * W

        x_in = x.reshape(NC, H, W)
        kern = functools.partial(_blur_kernel, taps=taps, pad=pad, norm=norm,
                                 stride=1, h_axis=1, w_axis=2)
        in_specs = [pl.BlockSpec((P, H, W), lambda i: (i, 0, 0))]
        out_specs = pl.BlockSpec((P, H, W), lambda i: (i, 0, 0))
        out_shape = jax.ShapeDtypeStruct((NC, H, W), x.dtype)

    vmem_limit = int(min(int(0.9 * cap),
                         max(32 * 1024 * 1024, 2 * per_elem * block_elems)))
    cost = pl.CostEstimate(
        flops=int((4 * K - 1) * NC * H * W),
        transcendentals=0,
        bytes_accessed=int(itemsize * NC * (H * W + H_out * W_out)),
    )

    out_raw = pl.pallas_call(
        kern,
        out_shape=out_shape,
        grid=grid,
        in_specs=in_specs,
        out_specs=out_specs,
        compiler_params=pltpu.CompilerParams(
            dimension_semantics=("parallel",),
            vmem_limit_bytes=vmem_limit,
        ),
        cost_estimate=cost,
    )(x_in)

    if use_lane_dense:
        out = out_raw.reshape(H_out, W_out, N, C).transpose(2, 3, 0, 1)
    else:
        out = out_raw.reshape(N, C, H, W)
        if s != 1:
            out = out[:, :, ::s, ::s]
    return out


def _reference_blur(x, f=(1.0, 2.0, 1.0), normalize=True, flip=False, stride=1):
    """Pure-JAX depthwise conv reference (mirrors F.conv2d groups=C)."""
    if f is None:
        return x
    fa = np.asarray(f, dtype=np.float32)
    k = fa[:, None] * fa[None, :]
    if normalize:
        k = k / k.sum()
    if flip:
        k = k[::-1, ::-1].copy()
    C = x.shape[1]
    w = jnp.broadcast_to(jnp.asarray(k)[None, None], (C, 1, k.shape[0], k.shape[1]))
    pad = (k.shape[0] - 1) // 2
    return jax.lax.conv_general_dilated(
        x, w,
        window_strides=(stride, stride),
        padding=((pad, pad), (pad, pad)),
        dimension_numbers=("NCHW", "OIHW", "NCHW"),
        feature_group_count=C,
    )


if __name__ == "__main__":
    key = jax.random.PRNGKey(0)
    N, C, H, W = 2, 4, 16, 16
    x = jax.random.normal(key, (N, C, H, W), dtype=jnp.float32)

    # stride=1 (module default) -- lane-dense path.
    out = jax.block_until_ready(blur2d(x, f=(1.0, 2.0, 1.0), stride=1))
    ref = _reference_blur(x, f=(1.0, 2.0, 1.0), stride=1)
    assert out.shape == (N, C, H, W), out.shape
    np.testing.assert_allclose(np.asarray(out), np.asarray(ref),
                               rtol=1e-5, atol=1e-5)

    # stride=2 (StyleGAN discriminator downsample path) -- in-kernel stride.
    out2 = jax.block_until_ready(blur2d(x, f=(1.0, 2.0, 1.0), stride=2))
    ref2 = _reference_blur(x, f=(1.0, 2.0, 1.0), stride=2)
    assert out2.shape == (N, C, H // 2, W // 2), out2.shape
    np.testing.assert_allclose(np.asarray(out2), np.asarray(ref2),
                               rtol=1e-5, atol=1e-5)

    # Multi-block + ragged cdiv grid on the lane axis (forced small block cap).
    x3 = jax.random.normal(jax.random.PRNGKey(1), (2, 100, 16, 16), jnp.float32)
    out3 = jax.block_until_ready(
        blur2d(x3, f=(1.0, 2.0, 1.0), stride=2, max_block_elems=16 * 16 * 128))
    ref3 = _reference_blur(x3, f=(1.0, 2.0, 1.0), stride=2)
    np.testing.assert_allclose(np.asarray(out3), np.asarray(ref3),
                               rtol=1e-5, atol=1e-5)

    # Large-spatial fallback path (planes leading, W on the lane axis).
    x4 = jax.random.normal(jax.random.PRNGKey(2), (1, 2, 128, 128), jnp.float32)
    out4 = jax.block_until_ready(blur2d(x4, f=(1.0, 2.0, 1.0), stride=1))
    ref4 = _reference_blur(x4, f=(1.0, 2.0, 1.0), stride=1)
    np.testing.assert_allclose(np.asarray(out4), np.asarray(ref4),
                               rtol=1e-5, atol=1e-5)

    print("KERNEL_OK")
</pallas_src>

<mosaic_0001>
module attributes {stable_mosaic.version = 11 : i64} {
  func.func @_blur_kernel(%arg0: i32, %arg1: memref<16x16x8xf32, #tpu.memory_space<vmem>>, %arg2: memref<16x16x8xf32, #tpu.memory_space<vmem>>) attributes {dimension_semantics = [#tpu.dimension_semantics<parallel>], iteration_bounds = array<i64: 1>, scalar_prefetch = 0 : i64, scratch_operands = 0 : i64, tpu.core_type = #tpu.core_type<tc>, window_params = [{transform_indices = @transform_0, window_bounds = array<i64: 16, 16, 8>}, {transform_indices = @transform_1, window_bounds = array<i64: 16, 16, 8>}]} {
    %c0 = arith.constant 0 : index
    %c0_0 = arith.constant 0 : index
    %c0_1 = arith.constant 0 : index
    %0 = vector.load %arg1[%c0, %c0_0, %c0_1] : memref<16x16x8xf32, #tpu.memory_space<vmem>>, vector<16x16x8xf32>
    %cst = arith.constant 0.000000e+00 : f32
    %1 = vector.broadcast %cst : f32 to vector<1x16x8xf32>
    %2 = vector.extract_strided_slice %0 {offsets = [0, 0, 0], sizes = [15, 16, 8], strides = [1, 1, 1]} : vector<16x16x8xf32> to vector<15x16x8xf32>
    %3 = tpu.concatenate %1, %2 in 0 : vector<1x16x8xf32>, vector<15x16x8xf32> -> vector<16x16x8xf32>
    %4 = arith.addf %0, %0 : vector<16x16x8xf32>
    %5 = arith.addf %3, %4 : vector<16x16x8xf32>
    %cst_2 = arith.constant 0.000000e+00 : f32
    %6 = vector.broadcast %cst_2 : f32 to vector<1x16x8xf32>
    %7 = vector.extract_strided_slice %0 {offsets = [1, 0, 0], sizes = [15, 16, 8], strides = [1, 1, 1]} : vector<16x16x8xf32> to vector<15x16x8xf32>
    %8 = tpu.concatenate %7, %6 in 0 : vector<15x16x8xf32>, vector<1x16x8xf32> -> vector<16x16x8xf32>
    %9 = arith.addf %5, %8 : vector<16x16x8xf32>
    %cst_3 = arith.constant 0.000000e+00 : f32
    %10 = vector.broadcast %cst_3 : f32 to vector<16x1x8xf32>
    %11 = vector.extract_strided_slice %9 {offsets = [0, 0, 0], sizes = [16, 15, 8], strides = [1, 1, 1]} : vector<16x16x8xf32> to vector<16x15x8xf32>
    %12 = tpu.concatenate %10, %11 in 1 : vector<16x1x8xf32>, vector<16x15x8xf32> -> vector<16x16x8xf32>
    %13 = arith.addf %9, %9 : vector<16x16x8xf32>
    %14 = arith.addf %12, %13 : vector<16x16x8xf32>
    %cst_4 = arith.constant 0.000000e+00 : f32
    %15 = vector.broadcast %cst_4 : f32 to vector<16x1x8xf32>
    %16 = vector.extract_strided_slice %9 {offsets = [0, 1, 0], sizes = [16, 15, 8], strides = [1, 1, 1]} : vector<16x16x8xf32> to vector<16x15x8xf32>
    %17 = tpu.concatenate %16, %15 in 1 : vector<16x15x8xf32>, vector<16x1x8xf32> -> vector<16x16x8xf32>
    %18 = arith.addf %14, %17 : vector<16x16x8xf32>
    %cst_5 = arith.constant 6.250000e-02 : f32
    %19 = vector.broadcast %cst_5 : f32 to vector<16x16x8xf32>
    %20 = arith.mulf %18, %19 : vector<16x16x8xf32>
    %c0_6 = arith.constant 0 : index
    %c0_7 = arith.constant 0 : index
    %c0_8 = arith.constant 0 : index
    %21 = vector.load %arg2[%c0_6, %c0_7, %c0_8] : memref<16x16x8xf32, #tpu.memory_space<vmem>>, vector<16x16x8xf32>
    tpu.vector_store %arg2[%c0_6, %c0_7, %c0_8], %20 {strides = array<i32>} : memref<16x16x8xf32, #tpu.memory_space<vmem>>, vector<16x16x8xf32>,
    return
  }
  func.func @transform_0(%arg0: i32) -> (i32, i32, i32) {
    %c0_i32 = arith.constant 0 : i32
    %c0_i32_0 = arith.constant 0 : i32
    %c0_i32_1 = arith.constant 0 : i32
    return %c0_i32, %c0_i32_0, %arg0 : i32, i32, i32
  }
  func.func @transform_1(%arg0: i32) -> (i32, i32, i32) {
    %c0_i32 = arith.constant 0 : i32
    %c0_i32_0 = arith.constant 0 : i32
    %c0_i32_1 = arith.constant 0 : i32
    return %c0_i32, %c0_i32_0, %arg0 : i32, i32, i32
  }
}

</mosaic_0001>

<bundles_post_ra>
// kernel: blur2d.1
= control target key start
LH: loop header
LB: loop body
LE: loop exit
PB: predicated region body
PF: predicated region fallthrough
CT: control target
= control target key end

     0   :  { %vm168_vm0 = vcmask 1040384   ;;  %vm329_vm1 = vcmask 1046528   ;;  %vm490_vm2 = vcmask 64512   ;;  %s909_s0 = inlined_call_operand.vmem [shape: f32[16,16,8], index: 0, kind: input, shape index: {}]   ;;  %s910_s1 = inlined_call_operand.vmem [shape: f32[16,16,8], index: 1, kind: output, shape index: {}]  }
   0x1   :  { %v8_v0 = vld [vmem:[%s909_s0] sm:$0xff]  ;;  %v9_v1 = vld [vmem:[%s909_s0 + $0x8] sm:$0xff]  ;;  %v10_v2 = vld [vmem:[%s909_s0 + $0x10] sm:$0xff] }
   0x2   :  { %v11_v3 = vld [vmem:[%s909_s0 + $0x18] sm:$0xff]  ;;  %v40_v4 = vadd.f32 %v8_v0, %v8_v0  ;;  %v41_v5 = vadd.f32 %v9_v1, %v9_v1  ;;  %v552_v6 = vld [vmem:[%s909_s0 + $0x20] sm:$0xff]  ;;  %v557_v7 = vld [vmem:[%s909_s0 + $0x28] sm:$0xff]  ;;  %v42_v8 = vadd.f32 %v10_v2, %v10_v2 }
   0x3   :  { %v43_v9 = vadd.f32 %v11_v3, %v11_v3  ;;  %v562_v10 = vld [vmem:[%s909_s0 + $0x30] sm:$0xff]  ;;  %v567_v11 = vld [vmem:[%s909_s0 + $0x38] sm:$0xff]  ;;  %v44_v12 = vadd.f32 %v552_v6, %v552_v6  ;;  %v45_v13 = vadd.f32 %v557_v7, %v557_v7  ;;  %v16_v62 = vld [vmem:[%s909_s0 + $0x40] sm:$0xff] }
   0x4   :  { %v104_v14 = vadd.f32 %v40_v4, %v10_v2  ;;  %v105_v15 = vadd.f32 %v41_v5, %v11_v3  ;;  %v74_v16 = vadd.f32 %v42_v8, %v8_v0  ;;  %v46_v17 = vadd.f32 %v562_v10, %v562_v10  ;;  %v608_v4 = vld [vmem:[%s909_s0 + $0x50] sm:$0xff]  ;;  %v613_v5 = vld [vmem:[%s909_s0 + $0x58] sm:$0xff] }
   0x5   :  { %v75_v18 = vadd.f32 %v43_v9, %v9_v1  ;;  %v76_v19 = vadd.f32 %v44_v12, %v10_v2  ;;  %v77_v20 = vadd.f32 %v45_v13, %v11_v3  ;;  %v47_v21 = vadd.f32 %v567_v11, %v567_v11  ;;  %v17_v2 = vld [vmem:[%s909_s0 + $0x48] sm:$0xff] }
   0x6   :  { %v169_v22 = vrot.slane %v104_v14, 7  ;;  %v265_v23 = vadd.f32 %v104_v14, %v104_v14  ;;  %v330_v24 = vrot.slane %v104_v14, 1  ;;  %v331_v25 = vrot.slane %v105_v15, 1 }
   0x7   :  { %v170_v26 = vrot.slane %v105_v15, 7  ;;  %v266_v27 = vadd.f32 %v105_v15, %v105_v15  ;;  %v106_v28 = vadd.f32 %v74_v16, %v552_v6  ;;  %v107_v29 = vadd.f32 %v75_v18, %v557_v7 }
   0x8   :  { %v249_v30 = vsel %vm168_vm0, 0.0, %v169_v22  ;;  %v332_v31 = vsel %vm329_vm1, %v330_v24, %v331_v25  ;;  %v410_v32 = vsel %vm329_vm1, %v331_v25, 0.0  ;;  %v108_v33 = vadd.f32 %v76_v19, %v562_v10 }
   0x9   :  { %v297_v34 = vadd.f32 %v265_v23, %v249_v30  ;;  %v171_v35 = vsel %vm168_vm0, %v169_v22, %v170_v26  ;;  %v172_v36 = vrot.slane %v106_v28, 7  ;;  %v267_v37 = vadd.f32 %v106_v28, %v106_v28 }
   0xa   :  { %v298_v38 = vadd.f32 %v266_v27, %v171_v35  ;;  %v333_v39 = vrot.slane %v106_v28, 1  ;;  %v334_v40 = vrot.slane %v107_v29, 1  ;;  %v173_v41 = vrot.slane %v107_v29, 7 }
   0xb   :  { %v426_v42 = vadd.f32 %v332_v31, %v297_v34  ;;  %v250_v43 = vsel %vm168_vm0, 0.0, %v172_v36  ;;  %v268_v44 = vadd.f32 %v107_v29, %v107_v29  ;;  %v109_v45 = vadd.f32 %v77_v20, %v567_v11 }
   0xc   :  { %v427_v46 = vadd.f32 %v410_v32, %v298_v38  ;;  %v299_v47 = vadd.f32 %v267_v37, %v250_v43  ;;  %v335_v48 = vsel %vm329_vm1, %v333_v39, %v334_v40  ;;  %v174_v49 = vsel %vm168_vm0, %v172_v36, %v173_v41 }
   0xd   :  { %v458_v50 = vmul.f32 0.0625, %v426_v42  ;;  %v300_v51 = vadd.f32 %v268_v44, %v174_v49  ;;  %v411_v52 = vsel %vm329_vm1, %v334_v40, 0.0  ;;  %v175_v53 = vrot.slane %v108_v33, 7  ;;  %v20_v49 = vld [vmem:[%s909_s0 + $0x60] sm:$0xff] }
   0xe   :  { %v459_v54 = vmul.f32 0.0625, %v427_v46  ;;  %v428_v55 = vadd.f32 %v335_v48, %v299_v47  ;;  %v269_v56 = vadd.f32 %v108_v33, %v108_v33  ;;  %v336_v57 = vrot.slane %v108_v33, 1 }
   0xf   :  { %491 = vst.msk [vmem:[%s910_s1] sm:$0xff] %vm490_vm2, %v458_v50  ;;  %v429_v58 = vadd.f32 %v411_v52, %v300_v51  ;;  %v251_v59 = vsel %vm168_vm0, 0.0, %v175_v53  ;;  %v337_v60 = vrot.slane %v109_v45, 1  ;;  %v176_v61 = vrot.slane %v109_v45, 7  ;;  %v21_v50 = vld [vmem:[%s909_s0 + $0x68] sm:$0xff]  ;;  %v657_v52 = vld [vmem:[%s909_s0 + $0x70] sm:$0xff] }
  0x10   :  { %492 = vst.msk [vmem:[%s910_s1 + $0x8] sm:$0xff] %vm490_vm2, %v459_v54  ;;  %v460_v63 = vmul.f32 0.0625, %v428_v55  ;;  %v301_v0 = vadd.f32 %v269_v56, %v251_v59  ;;  %v270_v1 = vadd.f32 %v109_v45, %v109_v45  ;;  %v78_v3 = vadd.f32 %v46_v17, %v552_v6 }
  0x11   :  { %v461_v8 = vmul.f32 0.0625, %v429_v58  ;;  %v338_v9 = vsel %vm329_vm1, %v336_v57, %v337_v60  ;;  %v177_v12 = vsel %vm168_vm0, %v175_v53, %v176_v61  ;;  %v412_v13 = vsel %vm329_vm1, %v337_v60, 0.0 }
  0x12   :  { %493 = vst.msk [vmem:[%s910_s1 + $0x10] sm:$0xff] %vm490_vm2, %v460_v63  ;;  %v430_v6 = vadd.f32 %v338_v9, %v301_v0  ;;  %v302_v14 = vadd.f32 %v270_v1, %v177_v12  ;;  %v79_v15 = vadd.f32 %v47_v21, %v557_v7  ;;  %v110_v16 = vadd.f32 %v78_v3, %v16_v62 }
  0x13   :  { %494 = vst.msk [vmem:[%s910_s1 + $0x18] sm:$0xff] %vm490_vm2, %v461_v8  ;;  %v48_v17 = vadd.f32 %v16_v62, %v16_v62  ;;  %v49_v18 = vadd.f32 %v17_v2, %v17_v2  ;;  %v50_v19 = vadd.f32 %v608_v4, %v608_v4  ;;  %v51_v20 = vadd.f32 %v613_v5, %v613_v5 }
  0x14   :  { %v462_v22 = vmul.f32 0.0625, %v430_v6  ;;  %v431_v23 = vadd.f32 %v412_v13, %v302_v14  ;;  %v111_v24 = vadd.f32 %v79_v15, %v17_v2  ;;  %v178_v25 = vrot.slane %v110_v16, 7  ;;  %v23_v14 = vld [vmem:[%s909_s0 + $0x78] sm:$0xff] }
  0x15   :  { %v271_v26 = vadd.f32 %v110_v16, %v110_v16  ;;  %v339_v7 = vrot.slane %v110_v16, 1  ;;  %v80_v21 = vadd.f32 %v48_v17, %v562_v10  ;;  %v81_v27 = vadd.f32 %v49_v18, %v567_v11 }
  0x16   :  { %495 = vst.msk [vmem:[%s910_s1 + $0x20] sm:$0xff] %vm490_vm2, %v462_v22  ;;  %v463_v28 = vmul.f32 0.0625, %v431_v23  ;;  %v252_v29 = vsel %vm168_vm0, 0.0, %v178_v25  ;;  %v340_v30 = vrot.slane %v111_v24, 1  ;;  %v179_v31 = vrot.slane %v111_v24, 7 }
  0x17   :  { %v303_v32 = vadd.f32 %v271_v26, %v252_v29  ;;  %v272_v33 = vadd.f32 %v111_v24, %v111_v24  ;;  %v112_v34 = vadd.f32 %v80_v21, %v608_v4  ;;  %v113_v35 = vadd.f32 %v81_v27, %v613_v5 }
  0x18   :  { %496 = vst.msk [vmem:[%s910_s1 + $0x28] sm:$0xff] %vm490_vm2, %v463_v28  ;;  %v341_v10 = vsel %vm329_vm1, %v339_v7, %v340_v30  ;;  %v180_v11 = vsel %vm168_vm0, %v178_v25, %v179_v31  ;;  %v413_v36 = vsel %vm329_vm1, %v340_v30, 0.0  ;;  %v82_v37 = vadd.f32 %v50_v19, %v16_v62  ;;  %v681_v19 = vld [vmem:[%s909_s0 + $0x80] sm:$0xff] }
  0x19   :  { %v432_v38 = vadd.f32 %v341_v10, %v303_v32  ;;  %v304_v39 = vadd.f32 %v272_v33, %v180_v11  ;;  %v181_v40 = vrot.slane %v112_v34, 7  ;;  %v273_v41 = vadd.f32 %v112_v34, %v112_v34 }
  0x1a   :  { %v342_v42 = vrot.slane %v112_v34, 1  ;;  %v343_v43 = vrot.slane %v113_v35, 1  ;;  %v182_v44 = vrot.slane %v113_v35, 7  ;;  %v274_v45 = vadd.f32 %v113_v35, %v113_v35 }
  0x1b   :  { %v464_v46 = vmul.f32 0.0625, %v432_v38  ;;  %v433_v47 = vadd.f32 %v413_v36, %v304_v39  ;;  %v253_v48 = vsel %vm168_vm0, 0.0, %v181_v40  ;;  %v83_v51 = vadd.f32 %v51_v20, %v17_v2  ;;  %v686_v20 = vld [vmem:[%s909_s0 + $0x88] sm:$0xff] }
  0x1c   :  { %v305_v53 = vadd.f32 %v273_v41, %v253_v48  ;;  %v344_v54 = vsel %vm329_vm1, %v342_v42, %v343_v43  ;;  %v183_v55 = vsel %vm168_vm0, %v181_v40, %v182_v44  ;;  %v414_v56 = vsel %vm329_vm1, %v343_v43, 0.0 }
  0x1d   :  { %497 = vst.msk [vmem:[%s910_s1 + $0x30] sm:$0xff] %vm490_vm2, %v464_v46  ;;  %v465_v57 = vmul.f32 0.0625, %v433_v47  ;;  %v306_v58 = vadd.f32 %v274_v45, %v183_v55  ;;  %v114_v59 = vadd.f32 %v82_v37, %v20_v49  ;;  %v115_v60 = vadd.f32 %v83_v51, %v21_v50 }
  0x1e   :  { %v434_v61 = vadd.f32 %v344_v54, %v305_v53  ;;  %v52_v62 = vadd.f32 %v20_v49, %v20_v49  ;;  %v53_v63 = vadd.f32 %v21_v50, %v21_v50  ;;  %v54_v0 = vadd.f32 %v657_v52, %v657_v52 }
  0x1f   :  { %498 = vst.msk [vmem:[%s910_s1 + $0x38] sm:$0xff] %vm490_vm2, %v465_v57  ;;  %v435_v1 = vadd.f32 %v414_v56, %v306_v58  ;;  %v184_v2 = vrot.slane %v114_v59, 7  ;;  %v275_v3 = vadd.f32 %v114_v59, %v114_v59  ;;  %v345_v8 = vrot.slane %v114_v59, 1  ;;  %v26_v57 = vld [vmem:[%s909_s0 + $0x90] sm:$0xff] }
  0x20   :  { %v466_v9 = vmul.f32 0.0625, %v434_v61  ;;  %v346_v12 = vrot.slane %v115_v60, 1  ;;  %v185_v13 = vrot.slane %v115_v60, 7  ;;  %v276_v6 = vadd.f32 %v115_v60, %v115_v60  ;;  %v27_v61 = vld [vmem:[%s909_s0 + $0x98] sm:$0xff] }
  0x21   :  { %v467_v15 = vmul.f32 0.0625, %v435_v1  ;;  %v254_v16 = vsel %vm168_vm0, 0.0, %v184_v2  ;;  %v84_v17 = vadd.f32 %v52_v62, %v608_v4  ;;  %v85_v18 = vadd.f32 %v53_v63, %v613_v5 }
  0x22   :  { %499 = vst.msk [vmem:[%s910_s1 + $0x40] sm:$0xff] %vm490_vm2, %v466_v9  ;;  %v307_v22 = vadd.f32 %v275_v3, %v254_v16  ;;  %v347_v4 = vsel %vm329_vm1, %v345_v8, %v346_v12  ;;  %v186_v5 = vsel %vm168_vm0, %v184_v2, %v185_v13  ;;  %v415_v23 = vsel %vm329_vm1, %v346_v12, 0.0 }
  0x23   :  { %500 = vst.msk [vmem:[%s910_s1 + $0x48] sm:$0xff] %vm490_vm2, %v467_v15  ;;  %v308_v24 = vadd.f32 %v276_v6, %v186_v5  ;;  %v116_v25 = vadd.f32 %v84_v17, %v657_v52  ;;  %v117_v26 = vadd.f32 %v85_v18, %v23_v14  ;;  %v55_v7 = vadd.f32 %v23_v14, %v23_v14 }
  0x24   :  { %v436_v21 = vadd.f32 %v347_v4, %v307_v22  ;;  %v86_v27 = vadd.f32 %v54_v0, %v20_v49  ;;  %v56_v28 = vadd.f32 %v681_v19, %v681_v19  ;;  %v57_v29 = vadd.f32 %v686_v20, %v686_v20  ;;  %v28_v22 = vld [vmem:[%s909_s0 + $0xa0] sm:$0xff] }
  0x25   :  { %v437_v30 = vadd.f32 %v415_v23, %v308_v24  ;;  %v187_v31 = vrot.slane %v116_v25, 7  ;;  %v277_v32 = vadd.f32 %v116_v25, %v116_v25  ;;  %v348_v33 = vrot.slane %v116_v25, 1  ;;  %v29_v24 = vld [vmem:[%s909_s0 + $0xa8] sm:$0xff] }
  0x26   :  { %v468_v34 = vmul.f32 0.0625, %v436_v21  ;;  %v349_v35 = vrot.slane %v117_v26, 1  ;;  %v188_v10 = vrot.slane %v117_v26, 7  ;;  %v278_v11 = vadd.f32 %v117_v26, %v117_v26  ;;  %v748_v26 = vld [vmem:[%s909_s0 + $0xb0] sm:$0xff] }
  0x27   :  { %v469_v36 = vmul.f32 0.0625, %v437_v30  ;;  %v255_v37 = vsel %vm168_vm0, 0.0, %v187_v31  ;;  %v87_v38 = vadd.f32 %v55_v7, %v21_v50  ;;  %v118_v39 = vadd.f32 %v86_v27, %v681_v19 }
  0x28   :  { %501 = vst.msk [vmem:[%s910_s1 + $0x50] sm:$0xff] %vm490_vm2, %v468_v34  ;;  %v309_v40 = vadd.f32 %v277_v32, %v255_v37  ;;  %v350_v41 = vsel %vm329_vm1, %v348_v33, %v349_v35  ;;  %v189_v42 = vsel %vm168_vm0, %v187_v31, %v188_v10  ;;  %v416_v43 = vsel %vm329_vm1, %v349_v35, 0.0  ;;  %v765_v34 = vld [vmem:[%s909_s0 + $0xb8] sm:$0xff] }
  0x29   :  { %502 = vst.msk [vmem:[%s910_s1 + $0x58] sm:$0xff] %vm490_vm2, %v469_v36  ;;  %v310_v44 = vadd.f32 %v278_v11, %v189_v42  ;;  %v119_v45 = vadd.f32 %v87_v38, %v686_v20  ;;  %v190_v46 = vrot.slane %v118_v39, 7  ;;  %v279_v47 = vadd.f32 %v118_v39, %v118_v39 }
  0x2a   :  { %v438_v48 = vadd.f32 %v350_v41, %v309_v40  ;;  %v351_v49 = vrot.slane %v118_v39, 1  ;;  %v88_v50 = vadd.f32 %v56_v28, %v657_v52  ;;  %v89_v51 = vadd.f32 %v57_v29, %v23_v14 }
  0x2b   :  { %v439_v53 = vadd.f32 %v416_v43, %v310_v44  ;;  %v256_v54 = vsel %vm168_vm0, 0.0, %v190_v46  ;;  %v352_v55 = vrot.slane %v119_v45, 1  ;;  %v191_v56 = vrot.slane %v119_v45, 7 }
  0x2c   :  { %v470_v58 = vmul.f32 0.0625, %v438_v48  ;;  %v311_v59 = vadd.f32 %v279_v47, %v256_v54  ;;  %v280_v60 = vadd.f32 %v119_v45, %v119_v45  ;;  %v120_v62 = vadd.f32 %v88_v50, %v26_v57  ;;  %v777_v45 = vld [vmem:[%s909_s0 + $0xc0] sm:$0xff] }
  0x2d   :  { %v471_v63 = vmul.f32 0.0625, %v439_v53  ;;  %v353_v52 = vsel %vm329_vm1, %v351_v49, %v352_v55  ;;  %v192_v0 = vsel %vm168_vm0, %v190_v46, %v191_v56  ;;  %v417_v1 = vsel %vm329_vm1, %v352_v55, 0.0 }
  0x2e   :  { %503 = vst.msk [vmem:[%s910_s1 + $0x60] sm:$0xff] %vm490_vm2, %v470_v58  ;;  %v440_v2 = vadd.f32 %v353_v52, %v311_v59  ;;  %v312_v3 = vadd.f32 %v280_v60, %v192_v0  ;;  %v121_v8 = vadd.f32 %v89_v51, %v27_v61  ;;  %v193_v9 = vrot.slane %v120_v62, 7 }
  0x2f   :  { %504 = vst.msk [vmem:[%s910_s1 + $0x68] sm:$0xff] %vm490_vm2, %v471_v63  ;;  %v281_v12 = vadd.f32 %v120_v62, %v120_v62  ;;  %v354_v13 = vrot.slane %v120_v62, 1  ;;  %v58_v6 = vadd.f32 %v26_v57, %v26_v57  ;;  %v59_v14 = vadd.f32 %v27_v61, %v27_v61 }
  0x30   :  { %v472_v15 = vmul.f32 0.0625, %v440_v2  ;;  %v441_v16 = vadd.f32 %v417_v1, %v312_v3  ;;  %v257_v17 = vsel %vm168_vm0, 0.0, %v193_v9  ;;  %v355_v18 = vrot.slane %v121_v8, 1  ;;  %v33_v3 = vld [vmem:[%s909_s0 + $0xc8] sm:$0xff] }
  0x31   :  { %v313_v4 = vadd.f32 %v281_v12, %v257_v17  ;;  %v194_v5 = vrot.slane %v121_v8, 7  ;;  %v282_v23 = vadd.f32 %v121_v8, %v121_v8  ;;  %v90_v25 = vadd.f32 %v58_v6, %v681_v19 }
  0x32   :  { %505 = vst.msk [vmem:[%s910_s1 + $0x70] sm:$0xff] %vm490_vm2, %v472_v15  ;;  %v473_v7 = vmul.f32 0.0625, %v441_v16  ;;  %v356_v21 = vsel %vm329_vm1, %v354_v13, %v355_v18  ;;  %v418_v27 = vsel %vm329_vm1, %v355_v18, 0.0  ;;  %v91_v28 = vadd.f32 %v59_v14, %v686_v20 }
  0x33   :  { %v442_v29 = vadd.f32 %v356_v21, %v313_v4  ;;  %v195_v19 = vsel %vm168_vm0, %v193_v9, %v194_v5  ;;  %v122_v30 = vadd.f32 %v90_v25, %v28_v22  ;;  %v60_v31 = vadd.f32 %v28_v22, %v28_v22 }
  0x34   :  { %506 = vst.msk [vmem:[%s910_s1 + $0x78] sm:$0xff] %vm490_vm2, %v473_v7  ;;  %v314_v32 = vadd.f32 %v282_v23, %v195_v19  ;;  %v123_v33 = vadd.f32 %v91_v28, %v29_v24  ;;  %v61_v35 = vadd.f32 %v29_v24, %v29_v24  ;;  %v62_v20 = vadd.f32 %v748_v26, %v748_v26  ;;  %v35_v28 = vld [vmem:[%s909_s0 + $0xd8] sm:$0xff] }
  0x35   :  { %v474_v10 = vmul.f32 0.0625, %v442_v29  ;;  %v196_v11 = vrot.slane %v122_v30, 7  ;;  %v283_v36 = vadd.f32 %v122_v30, %v122_v30  ;;  %v357_v37 = vrot.slane %v122_v30, 1 }
  0x36   :  { %v443_v38 = vadd.f32 %v418_v27, %v314_v32  ;;  %v358_v39 = vrot.slane %v123_v33, 1  ;;  %v197_v40 = vrot.slane %v123_v33, 7  ;;  %v284_v41 = vadd.f32 %v123_v33, %v123_v33  ;;  %v34_v27 = vld [vmem:[%s909_s0 + $0xd0] sm:$0xff] }
  0x37   :  { %507 = vst.msk [vmem:[%s910_s1 + $0x80] sm:$0xff] %vm490_vm2, %v474_v10  ;;  %v258_v42 = vsel %vm168_vm0, 0.0, %v196_v11  ;;  %v92_v43 = vadd.f32 %v60_v31, %v26_v57  ;;  %v93_v44 = vadd.f32 %v61_v35, %v27_v61  ;;  %v63_v46 = vadd.f32 %v765_v34, %v765_v34  ;;  %v821_v35 = vld [vmem:[%s909_s0 + $0xe0] sm:$0xff] }
  0x38   :  { %v475_v47 = vmul.f32 0.0625, %v443_v38  ;;  %v315_v48 = vadd.f32 %v283_v36, %v258_v42  ;;  %v359_v49 = vsel %vm329_vm1, %v357_v37, %v358_v39  ;;  %v198_v50 = vsel %vm168_vm0, %v196_v11, %v197_v40 }
  0x39   :  { %v316_v51 = vadd.f32 %v284_v41, %v198_v50  ;;  %v419_v53 = vsel %vm329_vm1, %v358_v39, 0.0  ;;  %v124_v54 = vadd.f32 %v92_v43, %v748_v26  ;;  %v125_v55 = vadd.f32 %v93_v44, %v765_v34 }
  0x3a   :  { %508 = vst.msk [vmem:[%s910_s1 + $0x88] sm:$0xff] %vm490_vm2, %v475_v47  ;;  %v444_v56 = vadd.f32 %v359_v49, %v315_v48  ;;  %v94_v57 = vadd.f32 %v62_v20, %v28_v22  ;;  %v95_v58 = vadd.f32 %v63_v46, %v29_v24  ;;  %v64_v59 = vadd.f32 %v777_v45, %v777_v45  ;;  %v826_v20 = vld [vmem:[%s909_s0 + $0xe8] sm:$0xff] }
  0x3b   :  { %v445_v60 = vadd.f32 %v419_v53, %v316_v51  ;;  %v199_v61 = vrot.slane %v124_v54, 7  ;;  %v285_v62 = vadd.f32 %v124_v54, %v124_v54  ;;  %v360_v63 = vrot.slane %v124_v54, 1 }
  0x3c   :  { %v476_v52 = vmul.f32 0.0625, %v444_v56  ;;  %v361_v0 = vrot.slane %v125_v55, 1  ;;  %v200_v1 = vrot.slane %v125_v55, 7  ;;  %v286_v2 = vadd.f32 %v125_v55, %v125_v55 }
  0x3d   :  { %v477_v8 = vmul.f32 0.0625, %v445_v60  ;;  %v259_v9 = vsel %vm168_vm0, 0.0, %v199_v61  ;;  %v126_v12 = vadd.f32 %v94_v57, %v777_v45  ;;  %v127_v13 = vadd.f32 %v95_v58, %v33_v3  ;;  %v38_v57 = vld [vmem:[%s909_s0 + $0xf0] sm:$0xff]  ;;  %v39_v58 = vld [vmem:[%s909_s0 + $0xf8] sm:$0xff] }
  0x3e   :  { %509 = vst.msk [vmem:[%s910_s1 + $0x90] sm:$0xff] %vm490_vm2, %v476_v52  ;;  %v317_v6 = vadd.f32 %v285_v62, %v259_v9  ;;  %v362_v14 = vsel %vm329_vm1, %v360_v63, %v361_v0  ;;  %v201_v15 = vsel %vm168_vm0, %v199_v61, %v200_v1  ;;  %v420_v16 = vsel %vm329_vm1, %v361_v0, 0.0 }
  0x3f   :  { %510 = vst.msk [vmem:[%s910_s1 + $0x98] sm:$0xff] %vm490_vm2, %v477_v8  ;;  %v318_v17 = vadd.f32 %v286_v2, %v201_v15  ;;  %v202_v18 = vrot.slane %v126_v12, 7  ;;  %v287_v22 = vadd.f32 %v126_v12, %v126_v12  ;;  %v363_v4 = vrot.slane %v126_v12, 1 }
  0x40   :  { %v446_v5 = vadd.f32 %v362_v14, %v317_v6  ;;  %v364_v23 = vrot.slane %v127_v13, 1  ;;  %v203_v24 = vrot.slane %v127_v13, 7  ;;  %v288_v25 = vadd.f32 %v127_v13, %v127_v13 }
  0x41   :  { %v447_v7 = vadd.f32 %v420_v16, %v318_v17  ;;  %v260_v21 = vsel %vm168_vm0, 0.0, %v202_v18  ;;  %v65_v29 = vadd.f32 %v33_v3, %v33_v3  ;;  %v96_v19 = vadd.f32 %v64_v59, %v748_v26 }
  0x42   :  { %v478_v30 = vmul.f32 0.0625, %v446_v5  ;;  %v319_v31 = vadd.f32 %v287_v22, %v260_v21  ;;  %v365_v32 = vsel %vm329_vm1, %v363_v4, %v364_v23  ;;  %v204_v33 = vsel %vm168_vm0, %v202_v18, %v203_v24 }
  0x43   :  { %v479_v10 = vmul.f32 0.0625, %v447_v7  ;;  %v320_v11 = vadd.f32 %v288_v25, %v204_v33  ;;  %v421_v26 = vsel %vm329_vm1, %v364_v23, 0.0  ;;  %v97_v36 = vadd.f32 %v65_v29, %v765_v34 }
  0x44   :  { %511 = vst.msk [vmem:[%s910_s1 + $0xa0] sm:$0xff] %vm490_vm2, %v478_v30  ;;  %v448_v37 = vadd.f32 %v365_v32, %v319_v31  ;;  %v128_v38 = vadd.f32 %v96_v19, %v34_v27  ;;  %v66_v39 = vadd.f32 %v34_v27, %v34_v27  ;;  %v67_v40 = vadd.f32 %v35_v28, %v35_v28 }
  0x45   :  { %512 = vst.msk [vmem:[%s910_s1 + $0xa8] sm:$0xff] %vm490_vm2, %v479_v10  ;;  %v449_v41 = vadd.f32 %v421_v26, %v320_v11  ;;  %v129_v42 = vadd.f32 %v97_v36, %v35_v28  ;;  %v68_v43 = vadd.f32 %v821_v35, %v821_v35  ;;  %v69_v34 = vadd.f32 %v826_v20, %v826_v20 }
  0x46   :  { %v480_v44 = vmul.f32 0.0625, %v448_v37  ;;  %v205_v46 = vrot.slane %v128_v38, 7  ;;  %v289_v47 = vadd.f32 %v128_v38, %v128_v38  ;;  %v366_v48 = vrot.slane %v128_v38, 1 }
  0x47   :  { %v481_v49 = vmul.f32 0.0625, %v449_v41  ;;  %v367_v50 = vrot.slane %v129_v42, 1  ;;  %v206_v51 = vrot.slane %v129_v42, 7  ;;  %v290_v53 = vadd.f32 %v129_v42, %v129_v42 }
  0x48   :  { %513 = vst.msk [vmem:[%s910_s1 + $0xb0] sm:$0xff] %vm490_vm2, %v480_v44  ;;  %v261_v54 = vsel %vm168_vm0, 0.0, %v205_v46  ;;  %v98_v55 = vadd.f32 %v66_v39, %v777_v45  ;;  %v99_v56 = vadd.f32 %v67_v40, %v33_v3  ;;  %v100_v59 = vadd.f32 %v68_v43, %v34_v27 }
  0x49   :  { %514 = vst.msk [vmem:[%s910_s1 + $0xb8] sm:$0xff] %vm490_vm2, %v481_v49  ;;  %v321_v60 = vadd.f32 %v289_v47, %v261_v54  ;;  %v368_v61 = vsel %vm329_vm1, %v366_v48, %v367_v50  ;;  %v207_v45 = vsel %vm168_vm0, %v205_v46, %v206_v51  ;;  %v422_v62 = vsel %vm329_vm1, %v367_v50, 0.0 }
  0x4a   :  { %v322_v63 = vadd.f32 %v290_v53, %v207_v45  ;;  %v130_v52 = vadd.f32 %v98_v55, %v821_v35  ;;  %v131_v0 = vadd.f32 %v99_v56, %v826_v20  ;;  %v101_v1 = vadd.f32 %v69_v34, %v35_v28 }
  0x4b   :  { %v450_v2 = vadd.f32 %v368_v61, %v321_v60  ;;  %v132_v3 = vadd.f32 %v100_v59, %v38_v57  ;;  %v70_v8 = vadd.f32 %v38_v57, %v38_v57  ;;  %v71_v9 = vadd.f32 %v39_v58, %v39_v58 }
  0x4c   :  { %v451_v12 = vadd.f32 %v422_v62, %v322_v63  ;;  %v208_v13 = vrot.slane %v130_v52, 7  ;;  %v291_v6 = vadd.f32 %v130_v52, %v130_v52  ;;  %v369_v14 = vrot.slane %v130_v52, 1 }
  0x4d   :  { %v482_v15 = vmul.f32 0.0625, %v450_v2  ;;  %v370_v16 = vrot.slane %v131_v0, 1  ;;  %v209_v17 = vrot.slane %v131_v0, 7  ;;  %v292_v18 = vadd.f32 %v131_v0, %v131_v0 }
  0x4e   :  { %v483_v22 = vmul.f32 0.0625, %v451_v12  ;;  %v262_v4 = vsel %vm168_vm0, 0.0, %v208_v13  ;;  %v133_v5 = vadd.f32 %v101_v1, %v39_v58  ;;  %v211_v23 = vrot.slane %v132_v3, 7 }
  0x4f   :  { %515 = vst.msk [vmem:[%s910_s1 + $0xc0] sm:$0xff] %vm490_vm2, %v482_v15  ;;  %v323_v24 = vadd.f32 %v291_v6, %v262_v4  ;;  %v371_v25 = vsel %vm329_vm1, %v369_v14, %v370_v16  ;;  %v210_v7 = vsel %vm168_vm0, %v208_v13, %v209_v17  ;;  %v423_v21 = vsel %vm329_vm1, %v370_v16, 0.0 }
  0x50   :  { %516 = vst.msk [vmem:[%s910_s1 + $0xc8] sm:$0xff] %vm490_vm2, %v483_v22  ;;  %v324_v27 = vadd.f32 %v292_v18, %v210_v7  ;;  %v263_v28 = vsel %vm168_vm0, 0.0, %v211_v23  ;;  %v293_v29 = vadd.f32 %v132_v3, %v132_v3  ;;  %v372_v19 = vrot.slane %v132_v3, 1 }
  0x51   :  { %v452_v30 = vadd.f32 %v371_v25, %v323_v24  ;;  %v373_v31 = vrot.slane %v133_v5, 1  ;;  %v212_v32 = vrot.slane %v133_v5, 7  ;;  %v294_v33 = vadd.f32 %v133_v5, %v133_v5 }
  0x52   :  { %v453_v10 = vadd.f32 %v423_v21, %v324_v27  ;;  %v325_v11 = vadd.f32 %v293_v29, %v263_v28  ;;  %v102_v26 = vadd.f32 %v70_v8, %v821_v35  ;;  %v103_v36 = vadd.f32 %v71_v9, %v826_v20 }
  0x53   :  { %v484_v37 = vmul.f32 0.0625, %v452_v30  ;;  %v374_v38 = vsel %vm329_vm1, %v372_v19, %v373_v31  ;;  %v213_v39 = vsel %vm168_vm0, %v211_v23, %v212_v32  ;;  %v424_v40 = vsel %vm329_vm1, %v373_v31, 0.0 }
  0x54   :  { %v485_v41 = vmul.f32 0.0625, %v453_v10  ;;  %v454_v42 = vadd.f32 %v374_v38, %v325_v11  ;;  %v326_v43 = vadd.f32 %v294_v33, %v213_v39  ;;  %v214_v34 = vrot.slane %v102_v26, 7 }
  0x55   :  { %517 = vst.msk [vmem:[%s910_s1 + $0xd0] sm:$0xff] %vm490_vm2, %v484_v37  ;;  %v295_v44 = vadd.f32 %v102_v26, %v102_v26  ;;  %v375_v35 = vrot.slane %v102_v26, 1  ;;  %v376_v46 = vrot.slane %v103_v36, 1  ;;  %v215_v20 = vrot.slane %v103_v36, 7 }
  0x56   :  { %518 = vst.msk [vmem:[%s910_s1 + $0xd8] sm:$0xff] %vm490_vm2, %v485_v41  ;;  %v486_v47 = vmul.f32 0.0625, %v454_v42  ;;  %v455_v48 = vadd.f32 %v424_v40, %v326_v43  ;;  %v264_v49 = vsel %vm168_vm0, 0.0, %v214_v34  ;;  %v296_v50 = vadd.f32 %v103_v36, %v103_v36 }
  0x57   :  { %v327_v51 = vadd.f32 %v295_v44, %v264_v49  ;;  %v377_v53 = vsel %vm329_vm1, %v375_v35, %v376_v46  ;;  %v216_v54 = vsel %vm168_vm0, %v214_v34, %v215_v20  ;;  %v425_v55 = vsel %vm329_vm1, %v376_v46, 0.0 }
  0x58   :  { %519 = vst.msk [vmem:[%s910_s1 + $0xe0] sm:$0xff] %vm490_vm2, %v486_v47  ;;  %v487_v56 = vmul.f32 0.0625, %v455_v48  ;;  %v328_v57 = vadd.f32 %v296_v50, %v216_v54 }
  0x59   :  { %v456_v58 = vadd.f32 %v377_v53, %v327_v51 }
  0x5a   :  { %520 = vst.msk [vmem:[%s910_s1 + $0xe8] sm:$0xff] %vm490_vm2, %v487_v56  ;;  %v457_v59 = vadd.f32 %v425_v55, %v328_v57 }
  0x5b   :  { %v488_v60 = vmul.f32 0.0625, %v456_v58 }
  0x5c   :  { %v489_v61 = vmul.f32 0.0625, %v457_v59 }
  0x5d   :  { %521 = vst.msk [vmem:[%s910_s1 + $0xf0] sm:$0xff] %vm490_vm2, %v488_v60 }
  0x5e   :  { %522 = vst.msk [vmem:[%s910_s1 + $0xf8] sm:$0xff] %vm490_vm2, %v489_v61 }

</bundles_post_ra>
